<compile_context>
chip_gen: v5e
topology: v5e:2x2
jax: 0.10.0
libtpu: 0.0.40
codegen_flags: <defaults>
</compile_context>

<pallas_src>
import jax
import jax.numpy as jnp
from jax.experimental import pallas as pl
from jax.experimental.pallas import tpu as pltpu

LANE = 128


def _round_up(n, m):
    return (n + m - 1) // m * m


def mlp_kernel(x_ref, w1_ref, b1_ref, w2_ref, b2_ref, w3_ref, b3_ref,
               w4_ref, b4_ref, w5_ref, b5_ref, o_ref):
    # x_ref / weights are bf16; biases are f32 (1, dim) rows.
    h = x_ref[...]
    for w_ref, b_ref in ((w1_ref, b1_ref), (w2_ref, b2_ref),
                         (w3_ref, b3_ref), (w4_ref, b4_ref)):
        acc = jnp.dot(h, w_ref[...], preferred_element_type=jnp.float32)
        acc = jnp.maximum(acc + b_ref[...], 0.0)          # f32 epilogue
        h = acc.astype(jnp.bfloat16)                      # bf16 only for MXU
    out = jnp.dot(h, w5_ref[...], preferred_element_type=jnp.float32) + b5_ref[...]
    o_ref[...] = out.astype(o_ref.dtype)


def breakout_mlp_forward(x, params, *, max_tile_b=1024):
    """x: (batch, ...) — flattened to (batch, state_dim), mirroring x.view(B, -1)."""
    x = x.reshape(x.shape[0], -1)
    batch, state_dim = x.shape
    (w1, b1), (w2, b2), (w3, b3), (w4, b4), (w5, b5) = params
    n_actions = w5.shape[1]

    # --- lane padding of the 64-wide hidden and the output (zeros are inert) ---
    h4, h4p = w4.shape[1], _round_up(w4.shape[1], LANE)       # 64 -> 128
    n_pad = _round_up(n_actions, LANE)                        # n_actions -> 128
    w4p = jnp.pad(w4, ((0, 0), (0, h4p - h4)))
    b4p = jnp.pad(b4, (0, h4p - h4))
    w5p = jnp.pad(w5, ((0, h4p - h4), (0, n_pad - n_actions)))
    b5p = jnp.pad(b5, (0, n_pad - n_actions))

    # --- batch tiling: full batch if small, else large tiles over a parallel grid ---
    if batch <= max_tile_b:
        tile_b = _round_up(batch, 8)
        padded_batch = tile_b
    else:
        tile_b = max_tile_b
        padded_batch = _round_up(batch, tile_b)
    if padded_batch != batch:
        x = jnp.pad(x, ((0, padded_batch - batch), (0, 0)))
    grid = (padded_batch // tile_b,)

    # --- bf16 MXU operands, f32 biases ---
    xb = x.astype(jnp.bfloat16)
    ws = [w.astype(jnp.bfloat16) for w in (w1, w2, w3, w4p, w5p)]
    bs = [b.reshape(1, -1).astype(jnp.float32) for b in (b1, b2, b3, b4p, b5p)]

    resident = lambda a: pl.BlockSpec(a.shape, lambda i: (0, 0))  # VMEM-resident
    in_specs = [pl.BlockSpec((tile_b, state_dim), lambda i: (i, 0))]
    operands = [xb]
    for w, b in zip(ws, bs):
        in_specs += [resident(w), resident(b)]
        operands += [w, b]

    flops = 2 * padded_batch * sum(w.shape[0] * w.shape[1] for w in ws)
    bytes_accessed = (xb.size * 2 + sum(w.size * 2 for w in ws)
                      + sum(b.size * 4 for b in bs) + padded_batch * n_pad * 4)

    out = pl.pallas_call(
        mlp_kernel,
        out_shape=jax.ShapeDtypeStruct((padded_batch, n_pad), jnp.float32),
        grid=grid,
        in_specs=in_specs,
        out_specs=pl.BlockSpec((tile_b, n_pad), lambda i: (i, 0)),
        compiler_params=pltpu.CompilerParams(
            dimension_semantics=("parallel",)),
        cost_estimate=pl.CostEstimate(
            flops=flops, transcendentals=0, bytes_accessed=bytes_accessed),
    )(*operands)

    return out[:batch, :n_actions]


def init_params(key, state_dim, n_actions):
    """Deterministic init mimicking nn.Linear's uniform(-1/sqrt(fan_in), +)."""
    dims = [state_dim, 128, 128, 128, 64, n_actions]
    params = []
    for i in range(5):
        key, kw, kb = jax.random.split(key, 3)
        fan_in, fan_out = dims[i], dims[i + 1]
        bound = 1.0 / jnp.sqrt(jnp.float32(fan_in))
        w = jax.random.uniform(kw, (fan_in, fan_out), jnp.float32, -bound, bound)
        b = jax.random.uniform(kb, (fan_out,), jnp.float32, -bound, bound)
        params.append((w, b))
    return params


def reference_forward(x, params):
    """Pure-JAX reference with the same bf16-operand / f32-accumulate recipe."""
    h = x.reshape(x.shape[0], -1).astype(jnp.bfloat16)
    n = len(params)
    out = None
    for i, (w, b) in enumerate(params):
        acc = jnp.dot(h, w.astype(jnp.bfloat16),
                      preferred_element_type=jnp.float32) + b
        if i < n - 1:
            h = jnp.maximum(acc, 0.0).astype(jnp.bfloat16)
        else:
            out = acc
    return out


if __name__ == "__main__":
    key = jax.random.PRNGKey(0)
    batch, n_actions = 8, 4

    # Non-flat input to exercise x.view(B, -1): (8, 4, 8) -> state_dim = 32.
    key, kx = jax.random.split(key)
    x = jax.random.normal(kx, (batch, 4, 8), jnp.float32)
    state_dim = 4 * 8

    params = init_params(key, state_dim, n_actions)

    out = jax.block_until_ready(breakout_mlp_forward(x, params))
    ref = jax.block_until_ready(reference_forward(x, params))

    assert out.shape == (batch, n_actions)
    max_diff = float(jnp.max(jnp.abs(out - ref)))
    assert jnp.allclose(out, ref, atol=2e-3, rtol=2e-3), \
        f"mismatch vs JAX reference (max abs diff {max_diff})"

    print("KERNEL_OK")
</pallas_src>

<mosaic_0001>
module attributes {stable_mosaic.version = 11 : i64} {
  func.func @mlp_kernel(%arg0: i32, %arg1: memref<8x32xbf16, #tpu.memory_space<vmem>>, %arg2: memref<32x128xbf16, #tpu.memory_space<vmem>>, %arg3: memref<1x128xf32, #tpu.memory_space<vmem>>, %arg4: memref<128x128xbf16, #tpu.memory_space<vmem>>, %arg5: memref<1x128xf32, #tpu.memory_space<vmem>>, %arg6: memref<128x128xbf16, #tpu.memory_space<vmem>>, %arg7: memref<1x128xf32, #tpu.memory_space<vmem>>, %arg8: memref<128x128xbf16, #tpu.memory_space<vmem>>, %arg9: memref<1x128xf32, #tpu.memory_space<vmem>>, %arg10: memref<128x128xbf16, #tpu.memory_space<vmem>>, %arg11: memref<1x128xf32, #tpu.memory_space<vmem>>, %arg12: memref<8x128xf32, #tpu.memory_space<vmem>>) attributes {dimension_semantics = [#tpu.dimension_semantics<parallel>], iteration_bounds = array<i64: 1>, scalar_prefetch = 0 : i64, scratch_operands = 0 : i64, tpu.core_type = #tpu.core_type<tc>, window_params = [{transform_indices = @transform_0, window_bounds = array<i64: 8, 32>}, {pipeline_mode = #tpu.pipeline_mode<synchronous>, transform_indices = @transform_1, window_bounds = array<i64: 32, 128>}, {pipeline_mode = #tpu.pipeline_mode<synchronous>, transform_indices = @transform_2, window_bounds = array<i64: 1, 128>}, {pipeline_mode = #tpu.pipeline_mode<synchronous>, transform_indices = @transform_3, window_bounds = array<i64: 128, 128>}, {pipeline_mode = #tpu.pipeline_mode<synchronous>, transform_indices = @transform_4, window_bounds = array<i64: 1, 128>}, {pipeline_mode = #tpu.pipeline_mode<synchronous>, transform_indices = @transform_5, window_bounds = array<i64: 128, 128>}, {pipeline_mode = #tpu.pipeline_mode<synchronous>, transform_indices = @transform_6, window_bounds = array<i64: 1, 128>}, {pipeline_mode = #tpu.pipeline_mode<synchronous>, transform_indices = @transform_7, window_bounds = array<i64: 128, 128>}, {pipeline_mode = #tpu.pipeline_mode<synchronous>, transform_indices = @transform_8, window_bounds = array<i64: 1, 128>}, {pipeline_mode = #tpu.pipeline_mode<synchronous>, transform_indices = @transform_9, window_bounds = array<i64: 128, 128>}, {pipeline_mode = #tpu.pipeline_mode<synchronous>, transform_indices = @transform_10, window_bounds = array<i64: 1, 128>}, {transform_indices = @transform_11, window_bounds = array<i64: 8, 128>}]} {
    %c0 = arith.constant 0 : index
    %c0_0 = arith.constant 0 : index
    %0 = vector.load %arg1[%c0, %c0_0] : memref<8x32xbf16, #tpu.memory_space<vmem>>, vector<8x32xbf16>
    %c0_1 = arith.constant 0 : index
    %c0_2 = arith.constant 0 : index
    %1 = vector.load %arg2[%c0_1, %c0_2] : memref<32x128xbf16, #tpu.memory_space<vmem>>, vector<32x128xbf16>
    %cst = arith.constant dense<0.000000e+00> : vector<8x128xf32>
    %2 = tpu.matmul %0, %1, %cst {dimension_numbers = #tpu.dot_dimension_numbers<[1], [0], [0], [1], [0, 0, 1, 1], [], []>} : vector<8x32xbf16>, vector<32x128xbf16>, vector<8x128xf32> -> vector<8x128xf32>
    %c0_3 = arith.constant 0 : index
    %c0_4 = arith.constant 0 : index
    %3 = vector.load %arg3[%c0_3, %c0_4] : memref<1x128xf32, #tpu.memory_space<vmem>>, vector<1x128xf32>
    %4 = vector.broadcast %3 : vector<1x128xf32> to vector<8x128xf32>
    %5 = arith.addf %2, %4 : vector<8x128xf32>
    %cst_5 = arith.constant 0.000000e+00 : f32
    %6 = vector.broadcast %cst_5 : f32 to vector<8x128xf32>
    %7 = arith.maximumf %5, %6 : vector<8x128xf32>
    %8 = arith.truncf %7 : vector<8x128xf32> to vector<8x128xbf16>
    %c0_6 = arith.constant 0 : index
    %c0_7 = arith.constant 0 : index
    %9 = vector.load %arg4[%c0_6, %c0_7] : memref<128x128xbf16, #tpu.memory_space<vmem>>, vector<128x128xbf16>
    %cst_8 = arith.constant dense<0.000000e+00> : vector<8x128xf32>
    %10 = tpu.matmul %8, %9, %cst_8 {dimension_numbers = #tpu.dot_dimension_numbers<[1], [0], [0], [1], [0, 0, 1, 1], [], []>} : vector<8x128xbf16>, vector<128x128xbf16>, vector<8x128xf32> -> vector<8x128xf32>
    %c0_9 = arith.constant 0 : index
    %c0_10 = arith.constant 0 : index
    %11 = vector.load %arg5[%c0_9, %c0_10] : memref<1x128xf32, #tpu.memory_space<vmem>>, vector<1x128xf32>
    %12 = vector.broadcast %11 : vector<1x128xf32> to vector<8x128xf32>
    %13 = arith.addf %10, %12 : vector<8x128xf32>
    %cst_11 = arith.constant 0.000000e+00 : f32
    %14 = vector.broadcast %cst_11 : f32 to vector<8x128xf32>
    %15 = arith.maximumf %13, %14 : vector<8x128xf32>
    %16 = arith.truncf %15 : vector<8x128xf32> to vector<8x128xbf16>
    %c0_12 = arith.constant 0 : index
    %c0_13 = arith.constant 0 : index
    %17 = vector.load %arg6[%c0_12, %c0_13] : memref<128x128xbf16, #tpu.memory_space<vmem>>, vector<128x128xbf16>
    %cst_14 = arith.constant dense<0.000000e+00> : vector<8x128xf32>
    %18 = tpu.matmul %16, %17, %cst_14 {dimension_numbers = #tpu.dot_dimension_numbers<[1], [0], [0], [1], [0, 0, 1, 1], [], []>} : vector<8x128xbf16>, vector<128x128xbf16>, vector<8x128xf32> -> vector<8x128xf32>
    %c0_15 = arith.constant 0 : index
    %c0_16 = arith.constant 0 : index
    %19 = vector.load %arg7[%c0_15, %c0_16] : memref<1x128xf32, #tpu.memory_space<vmem>>, vector<1x128xf32>
    %20 = vector.broadcast %19 : vector<1x128xf32> to vector<8x128xf32>
    %21 = arith.addf %18, %20 : vector<8x128xf32>
    %cst_17 = arith.constant 0.000000e+00 : f32
    %22 = vector.broadcast %cst_17 : f32 to vector<8x128xf32>
    %23 = arith.maximumf %21, %22 : vector<8x128xf32>
    %24 = arith.truncf %23 : vector<8x128xf32> to vector<8x128xbf16>
    %c0_18 = arith.constant 0 : index
    %c0_19 = arith.constant 0 : index
    %25 = vector.load %arg8[%c0_18, %c0_19] : memref<128x128xbf16, #tpu.memory_space<vmem>>, vector<128x128xbf16>
    %cst_20 = arith.constant dense<0.000000e+00> : vector<8x128xf32>
    %26 = tpu.matmul %24, %25, %cst_20 {dimension_numbers = #tpu.dot_dimension_numbers<[1], [0], [0], [1], [0, 0, 1, 1], [], []>} : vector<8x128xbf16>, vector<128x128xbf16>, vector<8x128xf32> -> vector<8x128xf32>
    %c0_21 = arith.constant 0 : index
    %c0_22 = arith.constant 0 : index
    %27 = vector.load %arg9[%c0_21, %c0_22] : memref<1x128xf32, #tpu.memory_space<vmem>>, vector<1x128xf32>
    %28 = vector.broadcast %27 : vector<1x128xf32> to vector<8x128xf32>
    %29 = arith.addf %26, %28 : vector<8x128xf32>
    %cst_23 = arith.constant 0.000000e+00 : f32
    %30 = vector.broadcast %cst_23 : f32 to vector<8x128xf32>
    %31 = arith.maximumf %29, %30 : vector<8x128xf32>
    %32 = arith.truncf %31 : vector<8x128xf32> to vector<8x128xbf16>
    %c0_24 = arith.constant 0 : index
    %c0_25 = arith.constant 0 : index
    %33 = vector.load %arg10[%c0_24, %c0_25] : memref<128x128xbf16, #tpu.memory_space<vmem>>, vector<128x128xbf16>
    %cst_26 = arith.constant dense<0.000000e+00> : vector<8x128xf32>
    %34 = tpu.matmul %32, %33, %cst_26 {dimension_numbers = #tpu.dot_dimension_numbers<[1], [0], [0], [1], [0, 0, 1, 1], [], []>} : vector<8x128xbf16>, vector<128x128xbf16>, vector<8x128xf32> -> vector<8x128xf32>
    %c0_27 = arith.constant 0 : index
    %c0_28 = arith.constant 0 : index
    %35 = vector.load %arg11[%c0_27, %c0_28] : memref<1x128xf32, #tpu.memory_space<vmem>>, vector<1x128xf32>
    %36 = vector.broadcast %35 : vector<1x128xf32> to vector<8x128xf32>
    %37 = arith.addf %34, %36 : vector<8x128xf32>
    %c0_29 = arith.constant 0 : index
    %c0_30 = arith.constant 0 : index
    %38 = vector.load %arg12[%c0_29, %c0_30] : memref<8x128xf32, #tpu.memory_space<vmem>>, vector<8x128xf32>
    tpu.vector_store %arg12[%c0_29, %c0_30], %37 {strides = array<i32>} : memref<8x128xf32, #tpu.memory_space<vmem>>, vector<8x128xf32>,
    return
  }
  func.func @transform_0(%arg0: i32) -> (i32, i32) {
    %c0_i32 = arith.constant 0 : i32
    %c0_i32_0 = arith.constant 0 : i32
    return %arg0, %c0_i32 : i32, i32
  }
  func.func @transform_1(%arg0: i32) -> (i32, i32) {
    %c0_i32 = arith.constant 0 : i32
    %c0_i32_0 = arith.constant 0 : i32
    %c0_i32_1 = arith.constant 0 : i32
    return %c0_i32, %c0_i32_0 : i32, i32
  }
  func.func @transform_2(%arg0: i32) -> (i32, i32) {
    %c0_i32 = arith.constant 0 : i32
    %c0_i32_0 = arith.constant 0 : i32
    %c0_i32_1 = arith.constant 0 : i32
    return %c0_i32, %c0_i32_0 : i32, i32
  }
  func.func @transform_3(%arg0: i32) -> (i32, i32) {
    %c0_i32 = arith.constant 0 : i32
    %c0_i32_0 = arith.constant 0 : i32
    %c0_i32_1 = arith.constant 0 : i32
    return %c0_i32, %c0_i32_0 : i32, i32
  }
  func.func @transform_4(%arg0: i32) -> (i32, i32) {
    %c0_i32 = arith.constant 0 : i32
    %c0_i32_0 = arith.constant 0 : i32
    %c0_i32_1 = arith.constant 0 : i32
    return %c0_i32, %c0_i32_0 : i32, i32
  }
  func.func @transform_5(%arg0: i32) -> (i32, i32) {
    %c0_i32 = arith.constant 0 : i32
    %c0_i32_0 = arith.constant 0 : i32
    %c0_i32_1 = arith.constant 0 : i32
    return %c0_i32, %c0_i32_0 : i32, i32
  }
  func.func @transform_6(%arg0: i32) -> (i32, i32) {
    %c0_i32 = arith.constant 0 : i32
    %c0_i32_0 = arith.constant 0 : i32
    %c0_i32_1 = arith.constant 0 : i32
    return %c0_i32, %c0_i32_0 : i32, i32
  }
  func.func @transform_7(%arg0: i32) -> (i32, i32) {
    %c0_i32 = arith.constant 0 : i32
    %c0_i32_0 = arith.constant 0 : i32
    %c0_i32_1 = arith.constant 0 : i32
    return %c0_i32, %c0_i32_0 : i32, i32
  }
  func.func @transform_8(%arg0: i32) -> (i32, i32) {
    %c0_i32 = arith.constant 0 : i32
    %c0_i32_0 = arith.constant 0 : i32
    %c0_i32_1 = arith.constant 0 : i32
    return %c0_i32, %c0_i32_0 : i32, i32
  }
  func.func @transform_9(%arg0: i32) -> (i32, i32) {
    %c0_i32 = arith.constant 0 : i32
    %c0_i32_0 = arith.constant 0 : i32
    %c0_i32_1 = arith.constant 0 : i32
    return %c0_i32, %c0_i32_0 : i32, i32
  }
  func.func @transform_10(%arg0: i32) -> (i32, i32) {
    %c0_i32 = arith.constant 0 : i32
    %c0_i32_0 = arith.constant 0 : i32
    %c0_i32_1 = arith.constant 0 : i32
    return %c0_i32, %c0_i32_0 : i32, i32
  }
  func.func @transform_11(%arg0: i32) -> (i32, i32) {
    %c0_i32 = arith.constant 0 : i32
    %c0_i32_0 = arith.constant 0 : i32
    return %arg0, %c0_i32 : i32, i32
  }
}

</mosaic_0001>

<bundles_post_ra>
// kernel: tpu_custom_call.1
= control target key start
LH: loop header
LB: loop body
LE: loop exit
PB: predicated region body
PF: predicated region fallthrough
CT: control target
= control target key end

     0   :  { %16 = vsyncpa [#allocation3], 0  ;;  %s1006_s0 = inlined_call_operand.hbm [shape: bf16[8,32], index: 0, kind: input, shape index: {}]   ;;  %s1007_s1 = inlined_call_operand.hbm [shape: bf16[32,128], index: 1, kind: input, shape index: {}]   ;;  %s1008_s2 = inlined_call_operand.vmem [shape: f32[1,128], index: 2, kind: input, shape index: {}]   ;;  %s1009_s3 = inlined_call_operand.hbm [shape: bf16[128,128], index: 3, kind: input, shape index: {}]   ;;  %s1010_s4 = inlined_call_operand.vmem [shape: f32[1,128], index: 4, kind: input, shape index: {}]   ;;  %s1011_s5 = inlined_call_operand.hbm [shape: bf16[128,128], index: 5, kind: input, shape index: {}]   ;;  %s1012_s6 = inlined_call_operand.vmem [shape: f32[1,128], index: 6, kind: input, shape index: {}]   ;;  %s1013_s7 = inlined_call_operand.hbm [shape: bf16[128,128], index: 7, kind: input, shape index: {}]   ;;  %s1014_s8 = inlined_call_operand.vmem [shape: f32[1,128], index: 8, kind: input, shape index: {}]   ;;  %s1015_s9 = inlined_call_operand.hbm [shape: bf16[128,128], index: 9, kind: input, shape index: {}]   ;;  %s1016_s10 = inlined_call_operand.vmem [shape: f32[1,128], index: 10, kind: input, shape index: {}]   ;;  %s1017_s11 = inlined_call_operand.hbm [shape: f32[8,128], index: 11, kind: output, shape index: {}]  }
   0x1   :  { %17 = vsyncpa [#allocation6], 0 }
   0x2   :  { %18 = vsyncpa [#allocation9], 0 }
   0x3   :  { %19 = vsyncpa [#allocation12], 0  ;;  %s36_s19 = sshll.u32 %s1007_s1, 4  ;;  %s37_s19 = int_to_ptr.hbm [resolvable:$true] %s36_s19 }
   0x4   :  { %20 = vsyncpa [#allocation4], 0  ;;  %s886_s20 = smov [#allocation5]   ;;  %s66_s24 = sshll.u32 %s1011_s5, 4  ;;  %s67_s24 = int_to_ptr.hbm [resolvable:$true] %s66_s24 }
   0x5   :  { %s38_s21 = sshll.u32 %s886_s20, 4  ;;  %s887_s25 = smov 64   ;;  %s39_s21 = int_to_ptr.vmem [resolvable:$true] %s38_s21 }
   0x6   :  { %s888_s26 = smov 4   ;;  %s889_s27 = smov [#allocation8]  }
   0x7   :  { %44 = dma.hbm_to_vmem [thread:$0]  %s37_s19, 256, %s39_s21, [#allocation6], %s887_s25, %s887_s25, %s888_s26  }
   0x8   :  { %s68_s28 = sshll.u32 %s889_s27, 4  ;;  %s26_s30 = sshll.u32 %s1006_s0, 4  ;;  %s69_s28 = int_to_ptr.vmem [resolvable:$true] %s68_s28  ;;  %s27_s30 = int_to_ptr.hbm [resolvable:$true] %s26_s30 }
   0x9   :  { %74 = dma.hbm_to_vmem [thread:$0]  %s67_s24, 1024, %s69_s28, [#allocation9], %s887_s25, %s887_s25, %s888_s26  }
   0xa   :  { %s51_s13 = sshll.u32 %s1009_s3, 4  ;;  %s890_s14 = smov [#allocation2]   ;;  %s52_s13 = int_to_ptr.hbm [resolvable:$true] %s51_s13 }
   0xb   :  { %s28_s15 = sshll.u32 %s890_s14, 4  ;;  %s891_s16 = smov [#allocation7]   ;;  %s29_s15 = int_to_ptr.vmem [resolvable:$true] %s28_s15 }
   0xc   :  { %31 = dma.hbm_to_vmem [thread:$0]  %s27_s30, 64, %s29_s15, [#allocation3]  }
   0xd   :  { %s53_s17 = sshll.u32 %s891_s16, 4  ;;  %s81_s0 = sshll.u32 %s1013_s7, 4  ;;  %s54_s17 = int_to_ptr.vmem [resolvable:$true] %s53_s17  ;;  %s82_s0 = int_to_ptr.hbm [resolvable:$true] %s81_s0 }
   0xe   :  { %59 = dma.hbm_to_vmem [thread:$0]  %s52_s13, 1024, %s54_s17, [#allocation6], %s887_s25, %s887_s25, %s888_s26  }
   0xf   :  { %s96_s3 = sshll.u32 %s1015_s9, 4  ;;  %s892_s22 = smov [#allocation10]   ;;  %s97_s3 = int_to_ptr.hbm [resolvable:$true] %s96_s3 }
  0x10   :  { %s83_s23 = sshll.u32 %s892_s22, 4  ;;  %s893_s24 = smov [#allocation11]   ;;  %s84_s23 = int_to_ptr.vmem [resolvable:$true] %s83_s23 }
  0x11   :  { %89 = dma.hbm_to_vmem [thread:$0]  %s82_s0, 1024, %s84_s23, [#allocation9], %s887_s25, %s887_s25, %s888_s26  }
  0x12   :  { %s98_s7 = sshll.u32 %s893_s24, 4  ;;  %s99_s7 = int_to_ptr.vmem [resolvable:$true] %s98_s7 }
  0x13   :  { %104 = dma.hbm_to_vmem [thread:$0]  %s97_s3, 1024, %s99_s7, [#allocation12], %s887_s25, %s887_s25, %s888_s26  }
  0x14   :  { %876 = dma.done.wait [#allocation3], 64  }
  0x15   :  { %877 = vsyncadd [#allocation3], 4294967232 }
  0x16   :  { %878 = dma.done.wait [#allocation6], 1280  }
  0x17   :  { %879 = vsyncadd [#allocation6], 4294966016 }
  0x18   :  { %880 = dma.done.wait [#allocation9], 2048  }
  0x19   :  { %881 = vsyncadd [#allocation9], 4294965248 }
  0x1a   :  { %882 = dma.done.wait [#allocation12], 1024  }
  0x1b   :  { %883 = vsyncadd [#allocation12], 4294966272  ;;  %v661_v0 = vld [vmem:[#allocation5 + $0x8] sm:$0xff]  ;;  %v660_v2 = vld [vmem:[#allocation5] sm:$0xff]  ;;  %vm153_vm0 = vcmask 261120   ;;  %s894_s30 = smov [#allocation13]  }
  0x1c   :  { %v669_v1 = vld [vmem:[#allocation7 + $0x38] sm:$0xff]  ;;  %163 = vmatpush.bf16.msra.mxu0 %v661_v0  ;;  %v668_v3 = vld [vmem:[#allocation7 + $0x30] sm:$0xff]  ;;  %v132_v4 = vld [vmem:[#allocation2] sm:$0xf]  ;;  %s508_s5 = sshll.u32 %s894_s30, 4  ;;  %s510_s14 = sshll.u32 %s1017_s11, 4  ;;  %s509_s5 = int_to_ptr.vmem [resolvable:$true] %s508_s5  ;;  %s511_s14 = int_to_ptr.hbm [resolvable:$true] %s510_s14 }
  0x1d   :  { %240 = vmatpush.bf16.msra.mxu1 %v669_v1  ;;  %v667_v5 = vld [vmem:[#allocation7 + $0x28] sm:$0xff]  ;;  %v666_v6 = vld [vmem:[#allocation7 + $0x20] sm:$0xff]  ;;  %v665_v7 = vld [vmem:[#allocation7 + $0x18] sm:$0xff] }
  0x1e   :  { %v664_v8 = vld [vmem:[#allocation7 + $0x10] sm:$0xff]  ;;  %v663_v9 = vld [vmem:[#allocation7 + $0x8] sm:$0xff]  ;;  %v662_v10 = vld [vmem:[#allocation7] sm:$0xff] }
  0x1f   :  { %v677_v11 = vld [vmem:[#allocation8 + $0x38] sm:$0xff]  ;;  %v676_v12 = vld [vmem:[#allocation8 + $0x30] sm:$0xff]  ;;  %v675_v13 = vld [vmem:[#allocation8 + $0x28] sm:$0xff] }
  0x20   :  { %164 = vmatpush.bf16.msra.mxu0 %v660_v2  ;;  %323 = vmatpush.bf16.msra.mxu2 %v677_v11  ;;  %v674_v14 = vld [vmem:[#allocation8 + $0x20] sm:$0xff]  ;;  %v673_v15 = vld [vmem:[#allocation8 + $0x18] sm:$0xff]  ;;  %v672_v16 = vld [vmem:[#allocation8 + $0x10] sm:$0xff] }
  0x21   :  { %241 = vmatpush.bf16.msra.mxu1 %v668_v3  ;;  %v703_v17 = vld [vmem:[%s1008_s2] ss:$0 sm:$0xff]  ;;  %v670_v24 = vld [vmem:[#allocation8] sm:$0xff]  ;;  %v685_v25 = vld [vmem:[#allocation10 + $0x38] sm:$0xff] }
  0x22   :  { %v671_v23 = vld [vmem:[#allocation8 + $0x8] sm:$0xff]  ;;  %406 = vmatpush.bf16.msra.mxu3 %v685_v25  ;;  %v684_v26 = vld [vmem:[#allocation10 + $0x30] sm:$0xff]  ;;  %v682_v28 = vld [vmem:[#allocation10 + $0x20] sm:$0xff] }
  0x23   :  { %531 = vmatmul.msk.bf16.vlgmr.msra.gmra.mxu0 %vm153_vm0, %v132_v4  ;;  %v683_v27 = vld [vmem:[#allocation10 + $0x28] sm:$0xff]  ;;  %v681_v29 = vld [vmem:[#allocation10 + $0x18] sm:$0xff]  ;;  %v680_v30 = vld [vmem:[#allocation10 + $0x10] sm:$0xff] }
  0x24   :  { %324 = vmatpush.bf16.msra.mxu2 %v676_v12  ;;  %v704_v31 = vld [vmem:[%s1010_s4] ss:$0 sm:$0xff]  ;;  %v678_v38 = vld [vmem:[#allocation10] sm:$0xff]  ;;  %v693_v39 = vld [vmem:[#allocation11 + $0x38] sm:$0xff] }
  0x25   :  { %242 = vmatpush.bf16.msra.mxu1 %v667_v5  ;;  %v679_v37 = vld [vmem:[#allocation10 + $0x8] sm:$0xff]  ;;  %489 = vmatpush.bf16.msrb.mxu0 %v693_v39  ;;  %v692_v40 = vld [vmem:[#allocation11 + $0x30] sm:$0xff]  ;;  %v690_v42 = vld [vmem:[#allocation11 + $0x20] sm:$0xff] }
  0x26   :  { %407 = vmatpush.bf16.msra.mxu3 %v684_v26  ;;  %v691_v41 = vld [vmem:[#allocation11 + $0x28] sm:$0xff]  ;;  %v689_v43 = vld [vmem:[#allocation11 + $0x18] sm:$0xff]  ;;  %v688_v44 = vld [vmem:[#allocation11 + $0x10] sm:$0xff] }
  0x27   :  { %v705_v45 = vld [vmem:[%s1012_s6] ss:$0 sm:$0xff]  ;;  %v686_v52 = vld [vmem:[#allocation11] sm:$0xff] }
  0x28   :  { %325 = vmatpush.bf16.msra.mxu2 %v675_v13  ;;  %v687_v51 = vld [vmem:[#allocation11 + $0x8] sm:$0xff] }
  0x29   :  { %243 = vmatpush.bf16.msra.mxu1 %v666_v6  ;;  %490 = vmatpush.bf16.msrb.mxu0 %v692_v40  ;;  %v706_v53 = vld [vmem:[%s1014_s8] ss:$0 sm:$0xff] }
  0x2a   :  { %408 = vmatpush.bf16.msra.mxu3 %v683_v27  ;;  %v707_v59 = vld [vmem:[%s1016_s10] ss:$0 sm:$0xff] }
  0x2c   :  { %326 = vmatpush.bf16.msra.mxu2 %v674_v14 }
  0x2d   :  { %244 = vmatpush.bf16.msra.mxu1 %v665_v7  ;;  %491 = vmatpush.bf16.msrb.mxu0 %v691_v41 }
  0x2e   :  { %409 = vmatpush.bf16.msra.mxu3 %v682_v28 }
  0x30   :  { %327 = vmatpush.bf16.msra.mxu2 %v673_v15 }
  0x31   :  { %245 = vmatpush.bf16.msra.mxu1 %v664_v8  ;;  %492 = vmatpush.bf16.msrb.mxu0 %v690_v42 }
  0x32   :  { %410 = vmatpush.bf16.msra.mxu3 %v681_v29 }
  0x34   :  { %328 = vmatpush.bf16.msra.mxu2 %v672_v16 }
  0x35   :  { %246 = vmatpush.bf16.msra.mxu1 %v663_v9  ;;  %493 = vmatpush.bf16.msrb.mxu0 %v689_v43 }
  0x36   :  { %411 = vmatpush.bf16.msra.mxu3 %v680_v30 }
  0x38   :  { %329 = vmatpush.bf16.msra.mxu2 %v671_v23 }
  0x39   :  { %247 = vmatpush.bf16.msra.mxu1 %v662_v10  ;;  %494 = vmatpush.bf16.msrb.mxu0 %v688_v44 }
  0x3a   :  { %412 = vmatpush.bf16.msra.mxu3 %v679_v37 }
  0x3c   :  { %330 = vmatpush.bf16.msra.mxu2 %v670_v24 }
  0x3d   :  { %495 = vmatpush.bf16.msrb.mxu0 %v687_v51 }
  0x3e   :  { %413 = vmatpush.bf16.msra.mxu3 %v678_v38 }
  0x41   :  { %496 = vmatpush.bf16.msrb.mxu0 %v686_v52 }
  0xa0   :  { %v166_v18 = vpop.f32.mrf.mxu0 }
  0xa1   :  { %v167_v19 = vadd.f32 %v703_v17, %v166_v18 }
  0xa3   :  { %v170_v20 = vmax.f32 %v167_v19, 0.0 }
  0xa5   :  { %v171_v21 = vpack.c.bf16 %v170_v20, %v170_v20 }
  0xa7   :  { %248 = vmatmul.bf16.vlgmr.msra.gmra.mxu1 %v171_v21 }
  0xa8   :  { %v168_v22 = vpop.f32.mrf.mxu0 }
 0x124   :  { %v249_v32 = vpop.f32.mrf.mxu1 }
 0x125   :  { %v250_v33 = vadd.f32 %v704_v31, %v249_v32 }
 0x127   :  { %v253_v34 = vmax.f32 %v250_v33, 0.0 }
 0x129   :  { %v254_v35 = vpack.c.bf16 %v253_v34, %v253_v34 }
 0x12b   :  { %331 = vmatmul.bf16.vlgmr.msra.gmra.mxu2 %v254_v35 }
 0x12c   :  { %v251_v36 = vpop.f32.mrf.mxu1 }
 0x1ae   :  { %v332_v46 = vpop.f32.mrf.mxu2 }
 0x1af   :  { %v333_v47 = vadd.f32 %v705_v45, %v332_v46 }
 0x1b1   :  { %v336_v48 = vmax.f32 %v333_v47, 0.0 }
 0x1b3   :  { %v337_v49 = vpack.c.bf16 %v336_v48, %v336_v48 }
 0x1b5   :  { %414 = vmatmul.bf16.vlgmr.msra.gmra.mxu3 %v337_v49 }
 0x1b6   :  { %v334_v50 = vpop.f32.mrf.mxu2 }
 0x238   :  { %v415_v54 = vpop.f32.mrf.mxu3 }
 0x239   :  { %v416_v55 = vadd.f32 %v706_v53, %v415_v54 }
 0x23b   :  { %v419_v56 = vmax.f32 %v416_v55, 0.0 }
 0x23d   :  { %v420_v57 = vpack.c.bf16 %v419_v56, %v419_v56 }
 0x23f   :  { %497 = vmatmul.bf16.vlgmr.msrb.gmra.mxu0 %v420_v57 }
 0x240   :  { %v417_v58 = vpop.f32.mrf.mxu3 }
 0x2bc   :  { %v498_v60 = vpop.f32.mrf.mxu0 }
 0x2bd   :  { %v499_v61 = vadd.f32 %v707_v59, %v498_v60 }
 0x2bf   :  { %502 = vst [vmem:[#allocation13] sm:$0xff] %v499_v61 }
 0x2c0   :  { %513 = dma.vmem_to_hbm [thread:$0]  %s509_s5, 128, %s511_s14, [#allocation4]  }
 0x2c4   :  { %v500_v62 = vpop.f32.mrf.mxu0 }
 0x2c5   :  { %884 = dma.done.wait [#allocation4], 128  }
 0x2c6   :  { %885 = vsyncadd [#allocation4], 4294967168 }
 0x2c7   :  { %518 = vsyncpa [#allocation3], 1 }
 0x2c8   :  { %519 = vsyncpa [#allocation6], 1 }
 0x2c9   :  { %520 = vsyncpa [#allocation9], 1 }
 0x2ca   :  { %521 = vsyncpa [#allocation12], 1 }
 0x2cb   :  { %522 = vsyncpa [#allocation4], 1 }

</bundles_post_ra>
